<compile_context>
chip_gen: v5e
topology: v5e:2x2
jax: 0.10.0
libtpu: 0.0.40
codegen_flags: <defaults>
</compile_context>

<pallas_src>
import jax
import jax.numpy as jnp
from jax.experimental import pallas as pl
from jax.experimental.pallas import tpu as pltpu


# ~18 MiB per grid step: double-buffered (~2x) stays well under v7x's 64 MiB
# physical VMEM; v6e/v5e (128 MiB) have plenty of headroom.
_TARGET_BLOCK_BYTES = 18 << 20
_VMEM_LIMIT_CAP = 56 << 20
_LANE_CANDIDATES = (4096, 2048, 1024, 512, 256, 128)


def _round_up(x, m):
    return -(-x // m) * m


def _ad_kernel(ev_ref, mask_ref, out_ref):
    # axial diffusivity = eigenvalue-0 plane * mask  (pure elementwise).
    out_ref[...] = (
        ev_ref[...].astype(out_ref.dtype) * mask_ref[...].astype(out_ref.dtype)
    )


def _ad_pallas_2d(ev2d, m2d, out_dtype):
    """Elementwise multiply of two (rows, lane) arrays, lane % 128 == 0."""
    rows, lane = ev2d.shape
    bytes_per_elem = (
        jnp.dtype(ev2d.dtype).itemsize
        + jnp.dtype(m2d.dtype).itemsize
        + jnp.dtype(out_dtype).itemsize
    )

    # Largest sublane-aligned row tile keeping one step near the VMEM target.
    max_tr = max(32, (_TARGET_BLOCK_BYTES // (lane * bytes_per_elem)) // 32 * 32)

    if rows <= 32:
        tr = rows  # single full-extent block (always a legal block shape)
    elif rows <= 2 * max_tr:
        # Split small/medium inputs into >=2 balanced blocks so both of v7x's
        # TensorCores get work; multiple of 32 covers int8/bf16/f32 sublanes.
        tr = min(max_tr, _round_up(pl.cdiv(rows, 2), 32), rows)
    else:
        tr = max_tr

    grid = (pl.cdiv(rows, tr),)
    block_bytes = tr * lane * bytes_per_elem
    vmem_limit = int(min(max(3 * block_bytes, 8 << 20), _VMEM_LIMIT_CAP))

    return pl.pallas_call(
        _ad_kernel,
        out_shape=jax.ShapeDtypeStruct((rows, lane), out_dtype),
        grid=grid,
        in_specs=[
            pl.BlockSpec((tr, lane), lambda i: (i, 0)),
            pl.BlockSpec((tr, lane), lambda i: (i, 0)),
        ],
        out_specs=pl.BlockSpec((tr, lane), lambda i: (i, 0)),
        compiler_params=pltpu.CompilerParams(
            dimension_semantics=("parallel",),
            vmem_limit_bytes=vmem_limit,
        ),
    )(ev2d, m2d)


def ad_from_ev0(ev0, mask):
    """AD from a pre-sliced / planar eigenvalue-0 array (zero-copy fast path).

    ev0, mask: same shape.  Returns ev0 * mask with numpy dtype promotion.
    Prefer this entry point (or planar (E, ...) eigenvalue storage): it feeds
    the kernel contiguous data and avoids the strided eigenvals[..., 0] copy
    that otherwise dominates end-to-end HBM traffic.
    """
    assert ev0.shape == mask.shape, "mask must match ev0 shape"
    out_dtype = jnp.result_type(ev0.dtype, mask.dtype)
    n = ev0.size
    if n == 0:
        return jnp.zeros(ev0.shape, out_dtype)

    # Keep the mask narrow through the kernel (cast happens on the VPU inside).
    # bool is rewritten to int8 (same byte width) to avoid i1 memref lowering.
    mask_in = mask.astype(jnp.int8) if mask.dtype == jnp.bool_ else mask

    ev_flat = ev0.reshape(-1)
    m_flat = mask_in.reshape(-1)

    tail = n % 128
    main = n - tail

    parts = []
    if main:
        # Lane-dense layout: largest lane width dividing `main` -> the reshape
        # is a free bitcast (no padding pass) and output stores are unmasked.
        lane = next(c for c in _LANE_CANDIDATES if main % c == 0)
        rows = main // lane
        ev_main = ev_flat if tail == 0 else ev_flat[:main]
        m_main = m_flat if tail == 0 else m_flat[:main]
        out_main = _ad_pallas_2d(
            ev_main.reshape(rows, lane), m_main.reshape(rows, lane), out_dtype
        )
        parts.append(out_main.reshape(-1))
    if tail:
        # <128-element tail: one vreg of plain JAX work instead of a full
        # jnp.pad pass over both operands.
        parts.append(
            ev_flat[main:].astype(out_dtype) * m_flat[main:].astype(out_dtype)
        )

    flat = parts[0] if len(parts) == 1 else jnp.concatenate(parts)
    return flat.reshape(ev0.shape)


def ad_module(eigenvals, mask):
    """Pallas implementation of ADModule.forward.

    eigenvals: (..., E) eigenvalue array (only plane 0 is used)
    mask:      (...,)   array matching eigenvals[..., 0]
    returns:   {'ad': eigenvals[..., 0] * mask}
    """
    # NOTE: this strided slice is the dominant cost of the whole op (an extra
    # XLA copy pass over the eigenvalue tensor before the bandwidth-bound
    # kernel even runs).  If the producer can store eigenvalues planar
    # (shape (E, ...)) or hand over ev0 directly, call ad_from_ev0() instead.
    ev0 = eigenvals[..., 0]
    assert mask.shape == ev0.shape, "mask must match eigenvals[..., 0] shape"
    return {"ad": ad_from_ev0(ev0, mask)}


if __name__ == "__main__":
    key = jax.random.PRNGKey(0)
    k1, k2, k3, k4 = jax.random.split(key, 4)

    # Primary case: small DTI-like shapes (batch, x, y, 3 eigenvalues), with
    # the mask kept in a narrow native dtype (int8) per the perf review.
    B, X, Y, E = 2, 16, 16, 3
    eigenvals = jax.random.uniform(k1, (B, X, Y, E), dtype=jnp.float32)
    mask = (jax.random.uniform(k2, (B, X, Y)) > 0.3).astype(jnp.int8)

    ad = jax.block_until_ready(ad_module(eigenvals, mask)["ad"])
    ref = eigenvals[..., 0] * mask
    assert ad.shape == ref.shape and ad.dtype == ref.dtype
    assert jnp.allclose(ad, ref, atol=1e-6, rtol=1e-6), "mismatch (main case)"

    # Secondary case: element count not a multiple of 128 and a bool mask ->
    # exercises the prefix-kernel + tiny-tail path (no full jnp.pad pass).
    eigenvals2 = jax.random.uniform(k3, (2, 17, 16, E), dtype=jnp.float32)
    mask2 = jax.random.uniform(k4, (2, 17, 16)) > 0.5
    ad2 = jax.block_until_ready(ad_module(eigenvals2, mask2)["ad"])
    ref2 = eigenvals2[..., 0] * mask2
    assert jnp.allclose(ad2, ref2, atol=1e-6, rtol=1e-6), "mismatch (tail case)"

    print("KERNEL_OK")
</pallas_src>

<mosaic_0001>
module attributes {stable_mosaic.version = 11 : i64} {
  func.func @_ad_kernel(%arg0: i32, %arg1: memref<1x512xf32, #tpu.memory_space<vmem>>, %arg2: memref<1x512xi8, #tpu.memory_space<vmem>>, %arg3: memref<1x512xf32, #tpu.memory_space<vmem>>) attributes {dimension_semantics = [#tpu.dimension_semantics<parallel>], iteration_bounds = array<i64: 1>, scalar_prefetch = 0 : i64, scratch_operands = 0 : i64, tpu.core_type = #tpu.core_type<tc>, window_params = [{transform_indices = @transform_0, window_bounds = array<i64: 1, 512>}, {transform_indices = @transform_1, window_bounds = array<i64: 1, 512>}, {transform_indices = @transform_2, window_bounds = array<i64: 1, 512>}]} {
    %c0 = arith.constant 0 : index
    %c0_0 = arith.constant 0 : index
    %0 = vector.load %arg1[%c0, %c0_0] : memref<1x512xf32, #tpu.memory_space<vmem>>, vector<1x512xf32>
    %c0_1 = arith.constant 0 : index
    %c0_2 = arith.constant 0 : index
    %1 = vector.load %arg2[%c0_1, %c0_2] : memref<1x512xi8, #tpu.memory_space<vmem>>, vector<1x512xi8>
    %2 = arith.sitofp %1 : vector<1x512xi8> to vector<1x512xf32>
    %3 = arith.mulf %0, %2 : vector<1x512xf32>
    %c0_3 = arith.constant 0 : index
    %c0_4 = arith.constant 0 : index
    %4 = vector.load %arg3[%c0_3, %c0_4] : memref<1x512xf32, #tpu.memory_space<vmem>>, vector<1x512xf32>
    tpu.vector_store %arg3[%c0_3, %c0_4], %3 {strides = array<i32>} : memref<1x512xf32, #tpu.memory_space<vmem>>, vector<1x512xf32>,
    return
  }
  func.func @transform_0(%arg0: i32) -> (i32, i32) {
    %c0_i32 = arith.constant 0 : i32
    %c0_i32_0 = arith.constant 0 : i32
    return %arg0, %c0_i32 : i32, i32
  }
  func.func @transform_1(%arg0: i32) -> (i32, i32) {
    %c0_i32 = arith.constant 0 : i32
    %c0_i32_0 = arith.constant 0 : i32
    return %arg0, %c0_i32 : i32, i32
  }
  func.func @transform_2(%arg0: i32) -> (i32, i32) {
    %c0_i32 = arith.constant 0 : i32
    %c0_i32_0 = arith.constant 0 : i32
    return %arg0, %c0_i32 : i32, i32
  }
}

</mosaic_0001>

<bundles_post_ra>
// kernel: tpu_custom_call.1
= control target key start
LH: loop header
LB: loop body
LE: loop exit
PB: predicated region body
PF: predicated region fallthrough
CT: control target
= control target key end

     0   :  { %7 = vsyncpa [#allocation3], 0  ;;  %s190_s0 = inlined_call_operand.hbm [shape: f32[1,512], index: 0, kind: input, shape index: {}]   ;;  %s191_s1 = inlined_call_operand.hbm [shape: s8[1,512], index: 1, kind: input, shape index: {}]   ;;  %s192_s2 = inlined_call_operand.hbm [shape: f32[1,512], index: 2, kind: output, shape index: {}]  }
   0x1   :  { %8 = vsyncpa [#allocation6], 0 }
   0x2   :  { %9 = vsyncpa [#allocation4], 0  ;;  %s15_s11 = sshll.u32 %s190_s0, 4  ;;  %s163_s12 = smov [#allocation2]   ;;  %s16_s11 = int_to_ptr.hbm [resolvable:$true] %s15_s11 }
   0x3   :  { %s17_s13 = sshll.u32 %s163_s12, 4  ;;  %s26_s16 = sshll.u32 %s191_s1, 4  ;;  %s18_s13 = int_to_ptr.vmem [resolvable:$true] %s17_s13  ;;  %s27_s16 = int_to_ptr.hbm [resolvable:$true] %s26_s16 }
   0x4   :  { %20 = dma.hbm_to_vmem [thread:$0]  %s16_s11, 64, %s18_s13, [#allocation3]  }
   0x5   :  { %s164_s17 = smov [#allocation5]  }
   0x6   :  { %s28_s18 = sshll.u32 %s164_s17, 4  ;;  %s29_s18 = int_to_ptr.vmem [resolvable:$true] %s28_s18 }
   0x7   :  { %31 = dma.hbm_to_vmem [thread:$0]  %s27_s16, 64, %s29_s18, [#allocation6]  }
   0x8   :  { %157 = dma.done.wait [#allocation3], 64  }
   0x9   :  { %158 = vsyncadd [#allocation3], 4294967232 }
   0xa   :  { %159 = dma.done.wait [#allocation6], 64  }
   0xb   :  { %160 = vsyncadd [#allocation6], 4294967232  ;;  %v41_v0 = vld [vmem:[#allocation5] sm:$0xf]  ;;  %vm51_vm0 = vcmask 1040384   ;;  %vm53_vm1 = vcmask 1042434   ;;  %v59_v5 = vlaneseq }
   0xc   :  { %v42_v1 = vunpack.c.0.s8 %v41_v0  ;;  %v43_v2 = vunpack.c.1.s8 %v41_v0  ;;  %vm55_vm2 = vcmask 1041408   ;;  %v40_v9 = vld [vmem:[#allocation2] sm:$0xf]  ;;  %s165_s0 = smov [#allocation7]   ;;  %s71_s21 = sshll.u32 %s192_s2, 4  ;;  %s72_s21 = int_to_ptr.hbm [resolvable:$true] %s71_s21 }
   0xd   :  { %s69_s1 = sshll.u32 %s165_s0, 4  ;;  %vm61_vm3 = vcmp.lt.s32.totalorder %v59_v5, 512  ;;  %s70_s1 = int_to_ptr.vmem [resolvable:$true] %s69_s1 }
   0xe   :  { %v44_v3 = vcvt.s32.f32 %v42_v1  ;;  %v45_v4 = vcvt.s32.f32 %v43_v2 }
  0x10   :  { %v48_v6 = vrot.slane %v44_v3, 3  ;;  %v49_v7 = vrot.slane %v45_v4, 6  ;;  %v50_v8 = vrot.slane %v45_v4, 1 }
  0x12   :  { %v52_v10 = vsel %vm51_vm0, %v44_v3, %v48_v6  ;;  %v54_v11 = vsel %vm53_vm1, %v49_v7, %v50_v8 }
  0x13   :  { %v56_v12 = vsel %vm55_vm2, %v52_v10, %v54_v11 }
  0x14   :  { %v58_v13 = vmul.f32 %v56_v12, %v40_v9 }
  0x16   :  { %63 = vst.msk [vmem:[#allocation7] sm:$0xf] %vm61_vm3, %v58_v13 }
  0x17   :  { %74 = dma.vmem_to_hbm [thread:$0]  %s70_s1, 64, %s72_s21, [#allocation4]  }
  0x18   :  { %161 = dma.done.wait [#allocation4], 64  }
  0x19   :  { %162 = vsyncadd [#allocation4], 4294967232 }
  0x1a   :  { %79 = vsyncpa [#allocation3], 1 }
  0x1b   :  { %80 = vsyncpa [#allocation6], 1 }
  0x1c   :  { %81 = vsyncpa [#allocation4], 1 }

</bundles_post_ra>
